<compile_context>
chip_gen: v5e
topology: v5e:2x2
jax: 0.10.0
libtpu: 0.0.40
codegen_flags: <defaults>
</compile_context>

<pallas_src>
import functools
import math

import jax
import jax.numpy as jnp
from jax import lax
from jax.experimental import pallas as pl
from jax.experimental.pallas import tpu as pltpu


def _round_up(x, m):
    return (x + m - 1) // m * m


# ---------------------------------------------------------------------------
# in-kernel masked softmax over the LAST axis
# (torch.sparse.softmax semantics: rows with no edges -> all zeros)
# ---------------------------------------------------------------------------
def _masked_softmax_rows(logits, mask):
    neg = jnp.float32(-1e30)
    x = jnp.where(mask, logits, neg)
    m = jnp.max(x, axis=-1, keepdims=True)
    p = jnp.where(mask, jnp.exp(x - m), jnp.float32(0.0))
    s = jnp.sum(p, axis=-1, keepdims=True)
    return p * pl.reciprocal(jnp.maximum(s, jnp.float32(1e-30)), approx=True)


# ---------------------------------------------------------------------------
# user-side kernel: one U-tile per grid step, full item axis resident
# produces hLu, hSu tiles
# ---------------------------------------------------------------------------
def _dgsr_user_kernel(inv_sqrt_d,
                      u_ref, li_ref, i_ref, adj_ref, pV_ref, pK_ref,
                      w1t_ref, w2t_ref, w1bt_ref, w3t_ref,
                      hLu_ref, hSu_ref):
    f32, bf16 = jnp.float32, jnp.bfloat16

    adj = adj_ref[...]                                               # (TU, I)
    mask = adj != 0.0

    # linear projections on the MXU (weights pre-transposed: y = x @ W.T)
    Um = jnp.dot(u_ref[...], w2t_ref[...], preferred_element_type=f32)    # (TU, Hp)
    Im = jnp.dot(i_ref[...], w1t_ref[...], preferred_element_type=f32)    # (I, Hp)
    Imb = jnp.dot(i_ref[...], w1bt_ref[...], preferred_element_type=f32)  # (I, Hp)
    LIm = jnp.dot(li_ref[...], w3t_ref[...], preferred_element_type=f32)  # (TU, Hp)

    # ---------------- long-term (user side) ----------------
    # e[u,i] = <w2 u_u, w1 i_i>, restricted to edges (sparse_dense_mul)
    e = lax.dot_general(Um, Im, (((1,), (1,)), ((), ())),
                        preferred_element_type=f32) * adj            # (TU, I)

    pV = pV_ref[...]                                                 # (TU, I, Hp) bf16
    pK = pK_ref[...]

    # u_pV[u,i] = <w2 u_u, pV[u,i,:]>   (batched (1,Hp)x(I,Hp)^T on the MXU)
    u_pV = jnp.einsum('uqh,uih->uqi', Um.astype(bf16)[:, None, :], pV,
                      preferred_element_type=f32)[:, 0, :]           # (TU, I)

    alphas = _masked_softmax_rows((e + u_pV) * inv_sqrt_d, mask)     # (TU, I)

    # hLu[u] = sum_i alphas[u,i] * (w1b i_i + pK[u,i,:])
    pos_u = jnp.einsum('uqi,uih->uqh', alphas.astype(bf16)[:, None, :], pK,
                       preferred_element_type=f32)[:, 0, :]          # (TU, Hp)
    hLu_ref[...] = jnp.dot(alphas, Imb, preferred_element_type=f32) + pos_u

    # ---------------- short-term (user side) ----------------
    a = lax.dot_general(LIm, Im, (((1,), (1,)), ((), ())),
                        preferred_element_type=f32) * adj            # (TU, I)
    alphaS = _masked_softmax_rows(a * inv_sqrt_d, mask)
    # pass_messages with p = ones -> the "+1" folds into sum_i alphaS[u,i]
    hSu_ref[...] = (jnp.dot(alphaS, Im, preferred_element_type=f32)
                    + jnp.sum(alphaS, axis=-1, keepdims=True))


# ---------------------------------------------------------------------------
# item-side kernel: one I-tile per grid step, full user axis resident
# works in the transposed (I, U) view; produces hLi, hSi tiles
# ---------------------------------------------------------------------------
def _dgsr_item_kernel(inv_sqrt_d,
                      i_ref, u_ref, lu_ref, adjT_ref, pVt_ref, pKt_ref,
                      w1t_ref, w2t_ref, w2bt_ref, w4t_ref,
                      hLi_ref, hSi_ref):
    f32, bf16 = jnp.float32, jnp.bfloat16

    adjT = adjT_ref[...]                                             # (TI, U)
    mask = adjT != 0.0

    Im = jnp.dot(i_ref[...], w1t_ref[...], preferred_element_type=f32)    # (TI, Hp)
    Um = jnp.dot(u_ref[...], w2t_ref[...], preferred_element_type=f32)    # (U, Hp)
    Umb = jnp.dot(u_ref[...], w2bt_ref[...], preferred_element_type=f32)  # (U, Hp)
    LUm = jnp.dot(lu_ref[...], w4t_ref[...], preferred_element_type=f32)  # (U, Hp)

    # ---------------- long-term (item side) ----------------
    # eT[i,u] = <w1 i_i, w2 u_u>, restricted to edges
    eT = lax.dot_general(Im, Um, (((1,), (1,)), ((), ())),
                         preferred_element_type=f32) * adjT          # (TI, U)

    pVt = pVt_ref[...]                                               # (TI, U, Hp) bf16
    pKt = pKt_ref[...]

    # i_pK[i,u] = <w1 i_i, pK[u,i,:]>
    i_pK = jnp.einsum('bqh,buh->bqu', Im.astype(bf16)[:, None, :], pKt,
                      preferred_element_type=f32)[:, 0, :]           # (TI, U)

    betasT = _masked_softmax_rows((eT + i_pK) * inv_sqrt_d, mask)    # (TI, U)

    # hLi[i] = sum_u betas[i,u] * (w2b u_u + pV[u,i,:])
    pos_i = jnp.einsum('bqu,buh->bqh', betasT.astype(bf16)[:, None, :], pVt,
                       preferred_element_type=f32)[:, 0, :]          # (TI, Hp)
    hLi_ref[...] = jnp.dot(betasT, Umb, preferred_element_type=f32) + pos_i

    # ---------------- short-term (item side) ----------------
    bT = lax.dot_general(Im, LUm, (((1,), (1,)), ((), ())),
                         preferred_element_type=f32) * adjT          # (TI, U)
    betaST = _masked_softmax_rows(bT * inv_sqrt_d, mask)
    hSi_ref[...] = (jnp.dot(betaST, Um, preferred_element_type=f32)
                    + jnp.sum(betaST, axis=-1, keepdims=True))


# ---------------------------------------------------------------------------
# wrapper: padding, bf16 cast of pV/pK, glue gathers/transposes, pallas_calls
# ---------------------------------------------------------------------------
def dgsr_forward(params, u_emb, i_emb, adj, pV, pK, last_item_idx, last_user_idx):
    U, H = u_emb.shape
    I = i_emb.shape[0]
    inv_sqrt_d = float(1.0 / math.sqrt(H))

    f32, bf16 = jnp.float32, jnp.bfloat16
    Hp = _round_up(H, 128)          # lane-dense hidden dim

    # tile sizes: keep double-buffered bf16 pV/pK tiles under ~12 MiB so the
    # whole working set fits v7x's 64 MiB VMEM with headroom.
    budget = 12 * 1024 * 1024

    def pick_tile(rows8, inner):
        per_row = 2 * 2 * inner * Hp * 2          # 2 tensors x 2 buffers x bf16
        t = min(rows8, max(8, budget // max(per_row, 1)), 512)
        return max(8, (t // 8) * 8)

    Up8, Ip8 = _round_up(U, 8), _round_up(I, 8)
    TU = pick_tile(Up8, Ip8)
    TI = pick_tile(Ip8, Up8)
    Up = _round_up(U, TU)
    Ip = _round_up(I, TI)

    def pad2(x, r, c):
        return jnp.pad(x.astype(f32), ((0, r - x.shape[0]), (0, c - x.shape[1])))

    u_p = pad2(u_emb, Up, Hp)                     # (Up, Hp)
    i_p = pad2(i_emb, Ip, Hp)                     # (Ip, Hp)
    adj_p = pad2(adj, Up, Ip)                     # (Up, Ip)
    pV_p = jnp.pad(pV.astype(f32), ((0, Up - U), (0, Ip - I), (0, Hp - H))).astype(bf16)
    pK_p = jnp.pad(pK.astype(f32), ((0, Up - U), (0, Ip - I), (0, Hp - H))).astype(bf16)

    # glue gathers: i_embedded[last_u[1]] and u_embedded[last_i[1]]
    li_idx = jnp.pad(last_item_idx, (0, Up - U))
    lu_idx = jnp.pad(last_user_idx, (0, Up - U))
    last_item_emb = i_p[li_idx]                   # (Up, Hp)
    last_user_emb = u_p[lu_idx]                   # (Up, Hp)

    # pre-transposed, zero-padded weights (torch nn.Linear: y = x @ W.T)
    def padw(w):
        return pad2(w.T, Hp, Hp)

    w1t, w2t = padw(params["w1"]), padw(params["w2"])
    w1bt, w2bt = padw(params["w1b"]), padw(params["w2b"])
    w3t, w4t = padw(params["w3"]), padw(params["w4"])

    # item-major views for the item-side kernel (wrapper glue; done once in XLA)
    adjT_p = adj_p.T                              # (Ip, Up)
    pVt_p = jnp.transpose(pV_p, (1, 0, 2))        # (Ip, Up, Hp)
    pKt_p = jnp.transpose(pK_p, (1, 0, 2))        # (Ip, Up, Hp)

    cparams = pltpu.CompilerParams(
        dimension_semantics=("parallel",),        # shards tiles across 2 TCs on v7x
        vmem_limit_bytes=48 * 1024 * 1024,
    )

    def cost(rows, cols):
        flops = 2 * rows * cols * Hp * 6 + 4 * Hp * Hp * (rows + cols)
        byts = (2 * rows * cols * Hp * 2          # pV + pK (bf16)
                + rows * cols * 4                 # adjacency
                + (3 * rows + cols) * Hp * 4      # embeddings / gathers
                + 4 * Hp * Hp * 4                 # weights
                + 2 * rows * Hp * 4)              # outputs
        return pl.CostEstimate(flops=int(flops),
                               transcendentals=int(2 * rows * cols),
                               bytes_accessed=int(byts))

    # ---------------- user-side call: grid over U tiles ----------------
    hLu_p, hSu_p = pl.pallas_call(
        functools.partial(_dgsr_user_kernel, inv_sqrt_d),
        out_shape=(jax.ShapeDtypeStruct((Up, Hp), f32),
                   jax.ShapeDtypeStruct((Up, Hp), f32)),
        grid=(Up // TU,),
        in_specs=[
            pl.BlockSpec((TU, Hp), lambda n: (n, 0)),          # u_emb tile
            pl.BlockSpec((TU, Hp), lambda n: (n, 0)),          # i_emb[last_item] tile
            pl.BlockSpec((Ip, Hp), lambda n: (0, 0)),          # i_emb (resident)
            pl.BlockSpec((TU, Ip), lambda n: (n, 0)),          # adj tile
            pl.BlockSpec((TU, Ip, Hp), lambda n: (n, 0, 0)),   # pV tile (bf16)
            pl.BlockSpec((TU, Ip, Hp), lambda n: (n, 0, 0)),   # pK tile (bf16)
            pl.BlockSpec((Hp, Hp), lambda n: (0, 0)),          # w1^T
            pl.BlockSpec((Hp, Hp), lambda n: (0, 0)),          # w2^T
            pl.BlockSpec((Hp, Hp), lambda n: (0, 0)),          # w1b^T
            pl.BlockSpec((Hp, Hp), lambda n: (0, 0)),          # w3^T
        ],
        out_specs=(pl.BlockSpec((TU, Hp), lambda n: (n, 0)),
                   pl.BlockSpec((TU, Hp), lambda n: (n, 0))),
        compiler_params=cparams,
        cost_estimate=cost(Up, Ip),
    )(u_p, last_item_emb, i_p, adj_p, pV_p, pK_p, w1t, w2t, w1bt, w3t)

    # ---------------- item-side call: grid over I tiles ----------------
    hLi_p, hSi_p = pl.pallas_call(
        functools.partial(_dgsr_item_kernel, inv_sqrt_d),
        out_shape=(jax.ShapeDtypeStruct((Ip, Hp), f32),
                   jax.ShapeDtypeStruct((Ip, Hp), f32)),
        grid=(Ip // TI,),
        in_specs=[
            pl.BlockSpec((TI, Hp), lambda n: (n, 0)),          # i_emb tile
            pl.BlockSpec((Up, Hp), lambda n: (0, 0)),          # u_emb (resident)
            pl.BlockSpec((Up, Hp), lambda n: (0, 0)),          # u_emb[last_user] (resident)
            pl.BlockSpec((TI, Up), lambda n: (n, 0)),          # adj^T tile
            pl.BlockSpec((TI, Up, Hp), lambda n: (n, 0, 0)),   # pV^T tile (bf16)
            pl.BlockSpec((TI, Up, Hp), lambda n: (n, 0, 0)),   # pK^T tile (bf16)
            pl.BlockSpec((Hp, Hp), lambda n: (0, 0)),          # w1^T
            pl.BlockSpec((Hp, Hp), lambda n: (0, 0)),          # w2^T
            pl.BlockSpec((Hp, Hp), lambda n: (0, 0)),          # w2b^T
            pl.BlockSpec((Hp, Hp), lambda n: (0, 0)),          # w4^T
        ],
        out_specs=(pl.BlockSpec((TI, Hp), lambda n: (n, 0)),
                   pl.BlockSpec((TI, Hp), lambda n: (n, 0))),
        compiler_params=cparams,
        cost_estimate=cost(Ip, Up),
    )(i_p, u_p, last_user_emb, adjT_p, pVt_p, pKt_p, w1t, w2t, w2bt, w4t)

    return (hLu_p[:U, :H], hSu_p[:U, :H], hLi_p[:I, :H], hSi_p[:I, :H])


# ---------------------------------------------------------------------------
# pure-JAX reference (same math) for a sanity check
# ---------------------------------------------------------------------------
def _masked_softmax_ref(logits, mask, axis):
    neg = jnp.float32(-1e30)
    x = jnp.where(mask, logits, neg)
    m = jnp.max(x, axis=axis, keepdims=True)
    p = jnp.where(mask, jnp.exp(x - m), jnp.float32(0.0))
    s = jnp.sum(p, axis=axis, keepdims=True)
    return p / jnp.maximum(s, jnp.float32(1e-30))


def dgsr_reference(params, u_emb, i_emb, adj, pV, pK, last_item_idx, last_user_idx):
    with jax.default_matmul_precision("highest"):
        U, H = u_emb.shape
        sqrt_d = math.sqrt(H)
        mask = adj != 0.0
        Um = u_emb @ params["w2"].T
        Im = i_emb @ params["w1"].T
        Umb = u_emb @ params["w2b"].T
        Imb = i_emb @ params["w1b"].T
        e = (Um @ Im.T) * adj
        u_pV = jnp.sum(Um[:, None, :] * pV, axis=-1)
        i_pK = jnp.sum(Im[None, :, :] * pK, axis=-1)
        alphas = _masked_softmax_ref((e + u_pV) / sqrt_d, mask, axis=1)
        betasT = _masked_softmax_ref((e + i_pK) / sqrt_d, mask, axis=0)
        hLu = alphas @ Imb + jnp.sum(alphas[:, :, None] * pK, axis=1)
        hLi = betasT.T @ Umb + jnp.sum(betasT[:, :, None] * pV, axis=0)
        LIm = i_emb[last_item_idx] @ params["w3"].T
        LUm = u_emb[last_user_idx] @ params["w4"].T
        a = (LIm @ Im.T) * adj
        b = (LUm @ Im.T) * adj
        alphaS = _masked_softmax_ref(a / sqrt_d, mask, axis=1)
        betaST = _masked_softmax_ref(b / sqrt_d, mask, axis=0)
        hSu = alphaS @ (Im + 1.0)
        hSi = betaST.T @ (Um + 1.0)
        return hLu, hSu, hLi, hSi


# ---------------------------------------------------------------------------
if __name__ == "__main__":
    U, I, H = 8, 16, 32
    key = jax.random.PRNGKey(0)
    ks = jax.random.split(key, 12)

    scale = 1.0 / math.sqrt(H)  # deterministic nn.Linear-like init
    params = {
        "w1":  jax.random.uniform(ks[0], (H, H), jnp.float32, -scale, scale),
        "w2":  jax.random.uniform(ks[1], (H, H), jnp.float32, -scale, scale),
        "w1b": jax.random.uniform(ks[2], (H, H), jnp.float32, -scale, scale),
        "w2b": jax.random.uniform(ks[3], (H, H), jnp.float32, -scale, scale),
        "w3":  jax.random.uniform(ks[4], (H, H), jnp.float32, -scale, scale),
        "w4":  jax.random.uniform(ks[5], (H, H), jnp.float32, -scale, scale),
    }

    u_emb = jax.random.normal(ks[6], (U, H), jnp.float32) * 0.5
    i_emb = jax.random.normal(ks[7], (I, H), jnp.float32) * 0.5
    adj = (jax.random.uniform(ks[8], (U, I)) < 0.4).astype(jnp.float32)  # edge values = 1
    # positional embeddings are streamed to the kernel in bf16; pre-round them
    # so the f32 reference and the kernel see bit-identical inputs.
    pV = (jax.random.normal(ks[9], (U, I, H), jnp.float32) * 0.1
          ).astype(jnp.bfloat16).astype(jnp.float32)
    pK = (jax.random.normal(ks[10], (U, I, H), jnp.float32) * 0.1
          ).astype(jnp.bfloat16).astype(jnp.float32)
    idx_key1, idx_key2 = jax.random.split(ks[11])
    last_item_idx = jax.random.randint(idx_key1, (U,), 0, I)
    last_user_idx = jax.random.randint(idx_key2, (U,), 0, U)

    outs = dgsr_forward(params, u_emb, i_emb, adj, pV, pK, last_item_idx, last_user_idx)
    outs = jax.block_until_ready(outs)

    refs = dgsr_reference(params, u_emb, i_emb, adj, pV, pK, last_item_idx, last_user_idx)
    names = ["hLu", "hSu", "hLi", "hSi"]
    for name, o, r in zip(names, outs, refs):
        assert o.shape == r.shape and o.dtype == jnp.float32
        assert jnp.all(jnp.isfinite(o)), f"{name} has non-finite values"
        assert jnp.allclose(o, r, atol=5e-3, rtol=5e-3), f"{name} mismatch"

    print("KERNEL_OK")
</pallas_src>

<mosaic_0001>
module attributes {stable_mosaic.version = 11 : i64} {
  func.func @_dgsr_user_kernel(%arg0: i32, %arg1: memref<8x128xf32, #tpu.memory_space<vmem>>, %arg2: memref<8x128xf32, #tpu.memory_space<vmem>>, %arg3: memref<16x128xf32, #tpu.memory_space<vmem>>, %arg4: memref<8x16xf32, #tpu.memory_space<vmem>>, %arg5: memref<8x16x128xbf16, #tpu.memory_space<vmem>>, %arg6: memref<8x16x128xbf16, #tpu.memory_space<vmem>>, %arg7: memref<128x128xf32, #tpu.memory_space<vmem>>, %arg8: memref<128x128xf32, #tpu.memory_space<vmem>>, %arg9: memref<128x128xf32, #tpu.memory_space<vmem>>, %arg10: memref<128x128xf32, #tpu.memory_space<vmem>>, %arg11: memref<8x128xf32, #tpu.memory_space<vmem>>, %arg12: memref<8x128xf32, #tpu.memory_space<vmem>>) attributes {dimension_semantics = [#tpu.dimension_semantics<parallel>], iteration_bounds = array<i64: 1>, scalar_prefetch = 0 : i64, scratch_operands = 0 : i64, tpu.core_type = #tpu.core_type<tc>, window_params = [{transform_indices = @transform_0, window_bounds = array<i64: 8, 128>}, {transform_indices = @transform_1, window_bounds = array<i64: 8, 128>}, {pipeline_mode = #tpu.pipeline_mode<synchronous>, transform_indices = @transform_2, window_bounds = array<i64: 16, 128>}, {transform_indices = @transform_3, window_bounds = array<i64: 8, 16>}, {transform_indices = @transform_4, window_bounds = array<i64: 8, 16, 128>}, {transform_indices = @transform_5, window_bounds = array<i64: 8, 16, 128>}, {pipeline_mode = #tpu.pipeline_mode<synchronous>, transform_indices = @transform_6, window_bounds = array<i64: 128, 128>}, {pipeline_mode = #tpu.pipeline_mode<synchronous>, transform_indices = @transform_7, window_bounds = array<i64: 128, 128>}, {pipeline_mode = #tpu.pipeline_mode<synchronous>, transform_indices = @transform_8, window_bounds = array<i64: 128, 128>}, {pipeline_mode = #tpu.pipeline_mode<synchronous>, transform_indices = @transform_9, window_bounds = array<i64: 128, 128>}, {transform_indices = @transform_10, window_bounds = array<i64: 8, 128>}, {transform_indices = @transform_11, window_bounds = array<i64: 8, 128>}]} {
    %c0 = arith.constant 0 : index
    %c0_0 = arith.constant 0 : index
    %0 = vector.load %arg4[%c0, %c0_0] : memref<8x16xf32, #tpu.memory_space<vmem>>, vector<8x16xf32>
    %cst = arith.constant 0.000000e+00 : f32
    %1 = vector.broadcast %cst : f32 to vector<8x16xf32>
    %2 = arith.cmpf one, %0, %1 : vector<8x16xf32>
    %c0_1 = arith.constant 0 : index
    %c0_2 = arith.constant 0 : index
    %3 = vector.load %arg1[%c0_1, %c0_2] : memref<8x128xf32, #tpu.memory_space<vmem>>, vector<8x128xf32>
    %c0_3 = arith.constant 0 : index
    %c0_4 = arith.constant 0 : index
    %4 = vector.load %arg8[%c0_3, %c0_4] : memref<128x128xf32, #tpu.memory_space<vmem>>, vector<128x128xf32>
    %cst_5 = arith.constant dense<0.000000e+00> : vector<8x128xf32>
    %5 = tpu.matmul %3, %4, %cst_5 {dimension_numbers = #tpu.dot_dimension_numbers<[1], [0], [0], [1], [0, 0, 1, 1], [], []>} : vector<8x128xf32>, vector<128x128xf32>, vector<8x128xf32> -> vector<8x128xf32>
    %c0_6 = arith.constant 0 : index
    %c0_7 = arith.constant 0 : index
    %6 = vector.load %arg3[%c0_6, %c0_7] : memref<16x128xf32, #tpu.memory_space<vmem>>, vector<16x128xf32>
    %c0_8 = arith.constant 0 : index
    %c0_9 = arith.constant 0 : index
    %7 = vector.load %arg7[%c0_8, %c0_9] : memref<128x128xf32, #tpu.memory_space<vmem>>, vector<128x128xf32>
    %cst_10 = arith.constant dense<0.000000e+00> : vector<16x128xf32>
    %8 = tpu.matmul %6, %7, %cst_10 {dimension_numbers = #tpu.dot_dimension_numbers<[1], [0], [0], [1], [0, 0, 1, 1], [], []>} : vector<16x128xf32>, vector<128x128xf32>, vector<16x128xf32> -> vector<16x128xf32>
    %c0_11 = arith.constant 0 : index
    %c0_12 = arith.constant 0 : index
    %9 = vector.load %arg3[%c0_11, %c0_12] : memref<16x128xf32, #tpu.memory_space<vmem>>, vector<16x128xf32>
    %c0_13 = arith.constant 0 : index
    %c0_14 = arith.constant 0 : index
    %10 = vector.load %arg9[%c0_13, %c0_14] : memref<128x128xf32, #tpu.memory_space<vmem>>, vector<128x128xf32>
    %cst_15 = arith.constant dense<0.000000e+00> : vector<16x128xf32>
    %11 = tpu.matmul %9, %10, %cst_15 {dimension_numbers = #tpu.dot_dimension_numbers<[1], [0], [0], [1], [0, 0, 1, 1], [], []>} : vector<16x128xf32>, vector<128x128xf32>, vector<16x128xf32> -> vector<16x128xf32>
    %c0_16 = arith.constant 0 : index
    %c0_17 = arith.constant 0 : index
    %12 = vector.load %arg2[%c0_16, %c0_17] : memref<8x128xf32, #tpu.memory_space<vmem>>, vector<8x128xf32>
    %c0_18 = arith.constant 0 : index
    %c0_19 = arith.constant 0 : index
    %13 = vector.load %arg10[%c0_18, %c0_19] : memref<128x128xf32, #tpu.memory_space<vmem>>, vector<128x128xf32>
    %cst_20 = arith.constant dense<0.000000e+00> : vector<8x128xf32>
    %14 = tpu.matmul %12, %13, %cst_20 {dimension_numbers = #tpu.dot_dimension_numbers<[1], [0], [0], [1], [0, 0, 1, 1], [], []>} : vector<8x128xf32>, vector<128x128xf32>, vector<8x128xf32> -> vector<8x128xf32>
    %cst_21 = arith.constant dense<0.000000e+00> : vector<8x16xf32>
    %15 = tpu.matmul %5, %8, %cst_21 {dimension_numbers = #tpu.dot_dimension_numbers<[1], [1], [0], [0], [0, 0, 1, 0], [], []>} : vector<8x128xf32>, vector<16x128xf32>, vector<8x16xf32> -> vector<8x16xf32>
    %16 = arith.mulf %15, %0 : vector<8x16xf32>
    %c0_22 = arith.constant 0 : index
    %c0_23 = arith.constant 0 : index
    %c0_24 = arith.constant 0 : index
    %17 = vector.load %arg5[%c0_22, %c0_23, %c0_24] : memref<8x16x128xbf16, #tpu.memory_space<vmem>>, vector<8x16x128xbf16>
    %c0_25 = arith.constant 0 : index
    %c0_26 = arith.constant 0 : index
    %c0_27 = arith.constant 0 : index
    %18 = vector.load %arg6[%c0_25, %c0_26, %c0_27] : memref<8x16x128xbf16, #tpu.memory_space<vmem>>, vector<8x16x128xbf16>
    %19 = arith.truncf %5 : vector<8x128xf32> to vector<8x128xbf16>
    %20 = vector.shape_cast %19 : vector<8x128xbf16> to vector<8x1x128xbf16>
    "tpu.trace_start"() <{level = 10 : i32, message = "uqh,uih->uqi"}> : () -> ()
    %cst_28 = arith.constant dense<0.000000e+00> : vector<8x1x16xf32>
    %21 = tpu.matmul %20, %17, %cst_28 {dimension_numbers = #tpu.dot_dimension_numbers<[2], [2], [1], [1], [0, 0, 0, 1, 1, 1], [0], [0]>} : vector<8x1x128xbf16>, vector<8x16x128xbf16>, vector<8x1x16xf32> -> vector<8x1x16xf32>
    "tpu.trace_stop"() : () -> ()
    %22 = vector.shape_cast %21 : vector<8x1x16xf32> to vector<8x16xf32>
    %23 = arith.addf %16, %22 : vector<8x16xf32>
    %cst_29 = arith.constant 0.176776692 : f32
    %24 = vector.broadcast %cst_29 : f32 to vector<8x16xf32>
    %25 = arith.mulf %23, %24 : vector<8x16xf32>
    %cst_30 = arith.constant -1.000000e+30 : f32
    %26 = vector.broadcast %cst_30 : f32 to vector<8x16xf32>
    %27 = arith.select %2, %25, %26 : vector<8x16xi1>, vector<8x16xf32>
    %cst_31 = arith.constant dense<0xFF800000> : vector<8xf32>
    %28 = vector.multi_reduction <maximumf>, %27, %cst_31 [1] : vector<8x16xf32> to vector<8xf32>
    %29 = vector.shape_cast %28 : vector<8xf32> to vector<8x1xf32>
    %30 = vector.broadcast %29 : vector<8x1xf32> to vector<8x16xf32>
    %31 = arith.subf %27, %30 : vector<8x16xf32>
    %32 = math.exp %31 : vector<8x16xf32>
    %cst_32 = arith.constant 0.000000e+00 : f32
    %33 = vector.broadcast %cst_32 : f32 to vector<8x16xf32>
    %34 = arith.select %2, %32, %33 : vector<8x16xi1>, vector<8x16xf32>
    %cst_33 = arith.constant dense<0.000000e+00> : vector<8xf32>
    %35 = vector.multi_reduction <add>, %34, %cst_33 [1] : vector<8x16xf32> to vector<8xf32>
    %36 = vector.shape_cast %35 : vector<8xf32> to vector<8x1xf32>
    %cst_34 = arith.constant 1.000000e-30 : f32
    %37 = vector.broadcast %cst_34 : f32 to vector<8x1xf32>
    %38 = arith.maximumf %36, %37 : vector<8x1xf32>
    %39 = tpu.reciprocal %38 {approx = true} : vector<8x1xf32> -> vector<8x1xf32>
    %40 = vector.broadcast %39 : vector<8x1xf32> to vector<8x16xf32>
    %41 = arith.mulf %34, %40 : vector<8x16xf32>
    %42 = arith.truncf %41 : vector<8x16xf32> to vector<8x16xbf16>
    %43 = vector.shape_cast %42 : vector<8x16xbf16> to vector<8x1x16xbf16>
    "tpu.trace_start"() <{level = 10 : i32, message = "uqi,uih->uqh"}> : () -> ()
    %cst_35 = arith.constant dense<0.000000e+00> : vector<8x1x128xf32>
    %44 = tpu.matmul %43, %18, %cst_35 {dimension_numbers = #tpu.dot_dimension_numbers<[2], [1], [1], [2], [0, 0, 0, 1, 1, 2], [0], [0]>} : vector<8x1x16xbf16>, vector<8x16x128xbf16>, vector<8x1x128xf32> -> vector<8x1x128xf32>
    "tpu.trace_stop"() : () -> ()
    %45 = vector.shape_cast %44 : vector<8x1x128xf32> to vector<8x128xf32>
    %cst_36 = arith.constant dense<0.000000e+00> : vector<8x128xf32>
    %46 = tpu.matmul %41, %11, %cst_36 {dimension_numbers = #tpu.dot_dimension_numbers<[1], [0], [0], [1], [0, 0, 1, 1], [], []>} : vector<8x16xf32>, vector<16x128xf32>, vector<8x128xf32> -> vector<8x128xf32>
    %47 = arith.addf %46, %45 : vector<8x128xf32>
    %c0_37 = arith.constant 0 : index
    %c0_38 = arith.constant 0 : index
    %48 = vector.load %arg11[%c0_37, %c0_38] : memref<8x128xf32, #tpu.memory_space<vmem>>, vector<8x128xf32>
    tpu.vector_store %arg11[%c0_37, %c0_38], %47 {strides = array<i32>} : memref<8x128xf32, #tpu.memory_space<vmem>>, vector<8x128xf32>,
    %cst_39 = arith.constant dense<0.000000e+00> : vector<8x16xf32>
    %49 = tpu.matmul %14, %8, %cst_39 {dimension_numbers = #tpu.dot_dimension_numbers<[1], [1], [0], [0], [0, 0, 1, 0], [], []>} : vector<8x128xf32>, vector<16x128xf32>, vector<8x16xf32> -> vector<8x16xf32>
    %50 = arith.mulf %49, %0 : vector<8x16xf32>
    %cst_40 = arith.constant 0.176776692 : f32
    %51 = vector.broadcast %cst_40 : f32 to vector<8x16xf32>
    %52 = arith.mulf %50, %51 : vector<8x16xf32>
    %cst_41 = arith.constant -1.000000e+30 : f32
    %53 = vector.broadcast %cst_41 : f32 to vector<8x16xf32>
    %54 = arith.select %2, %52, %53 : vector<8x16xi1>, vector<8x16xf32>
    %cst_42 = arith.constant dense<0xFF800000> : vector<8xf32>
    %55 = vector.multi_reduction <maximumf>, %54, %cst_42 [1] : vector<8x16xf32> to vector<8xf32>
    %56 = vector.shape_cast %55 : vector<8xf32> to vector<8x1xf32>
    %57 = vector.broadcast %56 : vector<8x1xf32> to vector<8x16xf32>
    %58 = arith.subf %54, %57 : vector<8x16xf32>
    %59 = math.exp %58 : vector<8x16xf32>
    %cst_43 = arith.constant 0.000000e+00 : f32
    %60 = vector.broadcast %cst_43 : f32 to vector<8x16xf32>
    %61 = arith.select %2, %59, %60 : vector<8x16xi1>, vector<8x16xf32>
    %cst_44 = arith.constant dense<0.000000e+00> : vector<8xf32>
    %62 = vector.multi_reduction <add>, %61, %cst_44 [1] : vector<8x16xf32> to vector<8xf32>
    %63 = vector.shape_cast %62 : vector<8xf32> to vector<8x1xf32>
    %cst_45 = arith.constant 1.000000e-30 : f32
    %64 = vector.broadcast %cst_45 : f32 to vector<8x1xf32>
    %65 = arith.maximumf %63, %64 : vector<8x1xf32>
    %66 = tpu.reciprocal %65 {approx = true} : vector<8x1xf32> -> vector<8x1xf32>
    %67 = vector.broadcast %66 : vector<8x1xf32> to vector<8x16xf32>
    %68 = arith.mulf %61, %67 : vector<8x16xf32>
    %cst_46 = arith.constant dense<0.000000e+00> : vector<8x128xf32>
    %69 = tpu.matmul %68, %8, %cst_46 {dimension_numbers = #tpu.dot_dimension_numbers<[1], [0], [0], [1], [0, 0, 1, 1], [], []>} : vector<8x16xf32>, vector<16x128xf32>, vector<8x128xf32> -> vector<8x128xf32>
    %cst_47 = arith.constant dense<0.000000e+00> : vector<8xf32>
    %70 = vector.multi_reduction <add>, %68, %cst_47 [1] : vector<8x16xf32> to vector<8xf32>
    %71 = vector.shape_cast %70 : vector<8xf32> to vector<8x1xf32>
    %72 = vector.broadcast %71 : vector<8x1xf32> to vector<8x128xf32>
    %73 = arith.addf %69, %72 : vector<8x128xf32>
    %c0_48 = arith.constant 0 : index
    %c0_49 = arith.constant 0 : index
    %74 = vector.load %arg12[%c0_48, %c0_49] : memref<8x128xf32, #tpu.memory_space<vmem>>, vector<8x128xf32>
    tpu.vector_store %arg12[%c0_48, %c0_49], %73 {strides = array<i32>} : memref<8x128xf32, #tpu.memory_space<vmem>>, vector<8x128xf32>,
    return
  }
  func.func @transform_0(%arg0: i32) -> (i32, i32) {
    %c0_i32 = arith.constant 0 : i32
    %c0_i32_0 = arith.constant 0 : i32
    return %arg0, %c0_i32 : i32, i32
  }
  func.func @transform_1(%arg0: i32) -> (i32, i32) {
    %c0_i32 = arith.constant 0 : i32
    %c0_i32_0 = arith.constant 0 : i32
    return %arg0, %c0_i32 : i32, i32
  }
  func.func @transform_2(%arg0: i32) -> (i32, i32) {
    %c0_i32 = arith.constant 0 : i32
    %c0_i32_0 = arith.constant 0 : i32
    %c0_i32_1 = arith.constant 0 : i32
    return %c0_i32, %c0_i32_0 : i32, i32
  }
  func.func @transform_3(%arg0: i32) -> (i32, i32) {
    %c0_i32 = arith.constant 0 : i32
    %c0_i32_0 = arith.constant 0 : i32
    return %arg0, %c0_i32 : i32, i32
  }
  func.func @transform_4(%arg0: i32) -> (i32, i32, i32) {
    %c0_i32 = arith.constant 0 : i32
    %c0_i32_0 = arith.constant 0 : i32
    %c0_i32_1 = arith.constant 0 : i32
    return %arg0, %c0_i32, %c0_i32_0 : i32, i32, i32
  }
  func.func @transform_5(%arg0: i32) -> (i32, i32, i32) {
    %c0_i32 = arith.constant 0 : i32
    %c0_i32_0 = arith.constant 0 : i32
    %c0_i32_1 = arith.constant 0 : i32
    return %arg0, %c0_i32, %c0_i32_0 : i32, i32, i32
  }
  func.func @transform_6(%arg0: i32) -> (i32, i32) {
    %c0_i32 = arith.constant 0 : i32
    %c0_i32_0 = arith.constant 0 : i32
    %c0_i32_1 = arith.constant 0 : i32
    return %c0_i32, %c0_i32_0 : i32, i32
  }
  func.func @transform_7(%arg0: i32) -> (i32, i32) {
    %c0_i32 = arith.constant 0 : i32
    %c0_i32_0 = arith.constant 0 : i32
    %c0_i32_1 = arith.constant 0 : i32
    return %c0_i32, %c0_i32_0 : i32, i32
  }
  func.func @transform_8(%arg0: i32) -> (i32, i32) {
    %c0_i32 = arith.constant 0 : i32
    %c0_i32_0 = arith.constant 0 : i32
    %c0_i32_1 = arith.constant 0 : i32
    return %c0_i32, %c0_i32_0 : i32, i32
  }
  func.func @transform_9(%arg0: i32) -> (i32, i32) {
    %c0_i32 = arith.constant 0 : i32
    %c0_i32_0 = arith.constant 0 : i32
    %c0_i32_1 = arith.constant 0 : i32
    return %c0_i32, %c0_i32_0 : i32, i32
  }
  func.func @transform_10(%arg0: i32) -> (i32, i32) {
    %c0_i32 = arith.constant 0 : i32
    %c0_i32_0 = arith.constant 0 : i32
    return %arg0, %c0_i32 : i32, i32
  }
  func.func @transform_11(%arg0: i32) -> (i32, i32) {
    %c0_i32 = arith.constant 0 : i32
    %c0_i32_0 = arith.constant 0 : i32
    return %arg0, %c0_i32 : i32, i32
  }
}

</mosaic_0001>

<bundles_post_ra>
// kernel: tpu_custom_call.1
= control target key start
LH: loop header
LB: loop body
LE: loop exit
PB: predicated region body
PF: predicated region fallthrough
CT: control target
= control target key end

     0   :  { %17 = vsyncpa [#allocation3], 0  ;;  %s1639_s0 = inlined_call_operand.hbm [shape: f32[8,128], index: 0, kind: input, shape index: {}]   ;;  %s1640_s1 = inlined_call_operand.hbm [shape: f32[8,128], index: 1, kind: input, shape index: {}]   ;;  %s1641_s2 = inlined_call_operand.hbm [shape: f32[16,128], index: 2, kind: input, shape index: {}]   ;;  %s1642_s3 = inlined_call_operand.hbm [shape: f32[8,16], index: 3, kind: input, shape index: {}]   ;;  %s1643_s4 = inlined_call_operand.hbm [shape: bf16[8,16,128], index: 4, kind: input, shape index: {}]   ;;  %s1644_s5 = inlined_call_operand.hbm [shape: bf16[8,16,128], index: 5, kind: input, shape index: {}]   ;;  %s1645_s6 = inlined_call_operand.hbm [shape: f32[128,128], index: 6, kind: input, shape index: {}]   ;;  %s1646_s7 = inlined_call_operand.hbm [shape: f32[128,128], index: 7, kind: input, shape index: {}]   ;;  %s1647_s8 = inlined_call_operand.hbm [shape: f32[128,128], index: 8, kind: input, shape index: {}]   ;;  %s1648_s9 = inlined_call_operand.hbm [shape: f32[128,128], index: 9, kind: input, shape index: {}]   ;;  %s1649_s10 = inlined_call_operand.hbm [shape: f32[8,128], index: 10, kind: output, shape index: {0}]   ;;  %s1650_s11 = inlined_call_operand.hbm [shape: f32[8,128], index: 11, kind: output, shape index: {1}]  }
   0x1   :  { %18 = vsyncpa [#allocation6], 0 }
   0x2   :  { %19 = vsyncpa [#allocation9], 0 }
   0x3   :  { %20 = vsyncpa [#allocation12], 0 }
   0x4   :  { %21 = vsyncpa [#allocation15], 0 }
   0x5   :  { %22 = vsyncpa [#allocation18], 0 }
   0x6   :  { %23 = vsyncpa [#allocation4], 0  ;;  %s41_s19 = sshll.u32 %s1640_s1, 4  ;;  %s42_s19 = int_to_ptr.hbm [resolvable:$true] %s41_s19 }
   0x7   :  { %24 = vsyncpa [#allocation21], 0  ;;  %s1437_s20 = smov [#allocation5]   ;;  %s65_s24 = sshll.u32 %s1642_s3, 4  ;;  %s66_s24 = int_to_ptr.hbm [resolvable:$true] %s65_s24 }
   0x8   :  { %s43_s21 = sshll.u32 %s1437_s20, 4  ;;  %s1438_s25 = smov [#allocation8]   ;;  %s44_s21 = int_to_ptr.vmem [resolvable:$true] %s43_s21 }
   0x9   :  { %46 = dma.hbm_to_vmem [thread:$0]  %s42_s19, 128, %s44_s21, [#allocation6]  }
   0xa   :  { %s67_s26 = sshll.u32 %s1438_s25, 4  ;;  %s88_s29 = sshll.u32 %s1644_s5, 4  ;;  %s68_s26 = int_to_ptr.vmem [resolvable:$true] %s67_s26  ;;  %s89_s29 = int_to_ptr.hbm [resolvable:$true] %s88_s29 }
   0xb   :  { %70 = dma.hbm_to_vmem [thread:$0]  %s66_s24, 128, %s68_s26, [#allocation9]  }
   0xc   :  { %s1439_s1 = smov [#allocation11]   ;;  %s1440_s12 = smov 64  }
   0xd   :  { %s90_s30 = sshll.u32 %s1439_s1, 4  ;;  %s1441_s13 = smov 4   ;;  %s91_s30 = int_to_ptr.vmem [resolvable:$true] %s90_s30 }
   0xe   :  { %96 = dma.hbm_to_vmem [thread:$0]  %s89_s29, 1024, %s91_s30, [#allocation12], %s1440_s12, %s1440_s12, %s1441_s13  }
   0xf   :  { %s114_s15 = sshll.u32 %s1646_s7, 4  ;;  %s1442_s16 = smov [#allocation14]   ;;  %s115_s15 = int_to_ptr.hbm [resolvable:$true] %s114_s15 }
  0x10   :  { %s116_s17 = sshll.u32 %s1442_s16, 4  ;;  %s30_s5 = sshll.u32 %s1639_s0, 4  ;;  %s117_s17 = int_to_ptr.vmem [resolvable:$true] %s116_s17  ;;  %s31_s5 = int_to_ptr.hbm [resolvable:$true] %s30_s5 }
  0x11   :  { %s1443_s20 = smov 128   ;;  %s1444_s21 = smov 8  }
  0x12   :  { %122 = dma.hbm_to_vmem [thread:$0]  %s115_s15, 2048, %s117_s17, [#allocation15], %s1443_s20, %s1443_s20, %s1444_s21  }
  0x13   :  { %s51_s24 = sshll.u32 %s1641_s2, 4  ;;  %s1445_s7 = smov [#allocation2]   ;;  %s52_s24 = int_to_ptr.hbm [resolvable:$true] %s51_s24 }
  0x14   :  { %s32_s25 = sshll.u32 %s1445_s7, 4  ;;  %s1446_s26 = smov [#allocation7]   ;;  %s33_s25 = int_to_ptr.vmem [resolvable:$true] %s32_s25 }
  0x15   :  { %35 = dma.hbm_to_vmem [thread:$0]  %s31_s5, 128, %s33_s25, [#allocation3]  }
  0x16   :  { %s53_s27 = sshll.u32 %s1446_s26, 4  ;;  %s75_s29 = sshll.u32 %s1643_s4, 4  ;;  %s54_s27 = int_to_ptr.vmem [resolvable:$true] %s53_s27  ;;  %s76_s29 = int_to_ptr.hbm [resolvable:$true] %s75_s29 }
  0x17   :  { %59 = dma.hbm_to_vmem [thread:$0]  %s52_s24, 256, %s54_s27, [#allocation6], %s1443_s20, %s1443_s20, %s1444_s21  }
  0x18   :  { %s101_s2 = sshll.u32 %s1645_s6, 4  ;;  %s1447_s3 = smov [#allocation10]   ;;  %s102_s2 = int_to_ptr.hbm [resolvable:$true] %s101_s2 }
  0x19   :  { %s77_s14 = sshll.u32 %s1447_s3, 4  ;;  %s1448_s15 = smov [#allocation13]   ;;  %s78_s14 = int_to_ptr.vmem [resolvable:$true] %s77_s14 }
  0x1a   :  { %83 = dma.hbm_to_vmem [thread:$0]  %s76_s29, 1024, %s78_s14, [#allocation9], %s1440_s12, %s1440_s12, %s1441_s13  }
  0x1b   :  { %s103_s4 = sshll.u32 %s1448_s15, 4  ;;  %s127_s18 = sshll.u32 %s1647_s8, 4  ;;  %s104_s4 = int_to_ptr.vmem [resolvable:$true] %s103_s4  ;;  %s128_s18 = int_to_ptr.hbm [resolvable:$true] %s127_s18 }
  0x1c   :  { %109 = dma.hbm_to_vmem [thread:$0]  %s102_s2, 2048, %s104_s4, [#allocation12], %s1443_s20, %s1443_s20, %s1444_s21  }
  0x1d   :  { %s140_s5 = sshll.u32 %s1648_s9, 4  ;;  %s1449_s22 = smov [#allocation16]   ;;  %s141_s5 = int_to_ptr.hbm [resolvable:$true] %s140_s5 }
  0x1e   :  { %s129_s23 = sshll.u32 %s1449_s22, 4  ;;  %s1450_s12 = smov [#allocation17]   ;;  %s130_s23 = int_to_ptr.vmem [resolvable:$true] %s129_s23 }
  0x1f   :  { %135 = dma.hbm_to_vmem [thread:$0]  %s128_s18, 2048, %s130_s23, [#allocation15], %s1443_s20, %s1443_s20, %s1444_s21  }
  0x20   :  { %s142_s8 = sshll.u32 %s1450_s12, 4  ;;  %s143_s8 = int_to_ptr.vmem [resolvable:$true] %s142_s8 }
  0x21   :  { %148 = dma.hbm_to_vmem [thread:$0]  %s141_s5, 2048, %s143_s8, [#allocation18], %s1443_s20, %s1443_s20, %s1444_s21  }
  0x22   :  { %1421 = dma.done.wait [#allocation3], 128  }
  0x23   :  { %1422 = vsyncadd [#allocation3], 4294967168 }
  0x24   :  { %1423 = dma.done.wait [#allocation6], 384  }
  0x25   :  { %1424 = vsyncadd [#allocation6], 4294966912 }
  0x26   :  { %1425 = dma.done.wait [#allocation9], 1152  }
  0x27   :  { %1426 = vsyncadd [#allocation9], 4294966144 }
  0x28   :  { %1427 = dma.done.wait [#allocation12], 3072  }
  0x29   :  { %1428 = vsyncadd [#allocation12], 4294964224 }
  0x2a   :  { %1429 = dma.done.wait [#allocation15], 4096  }
  0x2b   :  { %1430 = vsyncadd [#allocation15], 4294963200 }
  0x2c   :  { %1431 = dma.done.wait [#allocation18], 2048  }
  0x2d   :  { %1432 = vsyncadd [#allocation18], 4294965248  ;;  %v208_v0 = vld [vmem:[#allocation14 + $0x78] sm:$0xff]  ;;  %v207_v2 = vld [vmem:[#allocation14 + $0x70] sm:$0xff]  ;;  %vm402_vm0 = vcmask 1040384   ;;  %vm407_vm1 = vcmask 1041409  }
  0x2e   :  { %v246_v1 = vld [vmem:[#allocation13 + $0x78] sm:$0xff]  ;;  %209 = vmatpush.msra.mxu0 %v208_v0  ;;  %v245_v3 = vld [vmem:[#allocation13 + $0x70] sm:$0xff]  ;;  %v206_v4 = vld [vmem:[#allocation14 + $0x68] sm:$0xff]  ;;  %vm411_vm2 = vcmask 1042434   ;;  %vm415_vm3 = vcmask 1043459   ;;  %vm618_vm4 = vcmask 1044484  }
  0x2f   :  { %247 = vmatpush.msra.mxu1 %v246_v1  ;;  %v244_v5 = vld [vmem:[#allocation13 + $0x68] sm:$0xff]  ;;  %v205_v6 = vld [vmem:[#allocation14 + $0x60] sm:$0xff]  ;;  %v204_v8 = vld [vmem:[#allocation14 + $0x58] sm:$0xff]  ;;  %vm621_vm5 = vcmask 1045509   ;;  %vm624_vm6 = vcmask 1046534   ;;  %vm627_vm7 = vcmask 1047559  }
  0x30   :  { %210 = vmatpush.msra.mxu0 %v207_v2  ;;  %v243_v7 = vld [vmem:[#allocation13 + $0x60] sm:$0xff]  ;;  %v242_v9 = vld [vmem:[#allocation13 + $0x58] sm:$0xff]  ;;  %v203_v10 = vld [vmem:[#allocation14 + $0x50] sm:$0xff]  ;;  %vm633_vm9 = vcmask 130048   ;;  %s980_s20 = sshll.u32 %s1649_s10, 4  ;;  %s1451_s21 = smov [#allocation19]   ;;  %s981_s20 = int_to_ptr.hbm [resolvable:$true] %s980_s20 }
  0x31   :  { %248 = vmatpush.msra.mxu1 %v245_v3  ;;  %v241_v11 = vld [vmem:[#allocation13 + $0x50] sm:$0xff]  ;;  %v202_v12 = vld [vmem:[#allocation14 + $0x48] sm:$0xff]  ;;  %v201_v14 = vld [vmem:[#allocation14 + $0x40] sm:$0xff]  ;;  %s978_s24 = sshll.u32 %s1451_s21, 4  ;;  %s1452_s7 = smov [#allocation20]   ;;  %s979_s24 = int_to_ptr.vmem [resolvable:$true] %s978_s24 }
  0x32   :  { %211 = vmatpush.msra.mxu0 %v206_v4  ;;  %v240_v13 = vld [vmem:[#allocation13 + $0x48] sm:$0xff]  ;;  %v285_v15 = vld [vmem:[#allocation16 + $0x78] sm:$0xff]  ;;  %v239_v16 = vld [vmem:[#allocation13 + $0x40] sm:$0xff]  ;;  %s989_s25 = sshll.u32 %s1452_s7, 4  ;;  %s991_s0 = sshll.u32 %s1650_s11, 4  ;;  %s990_s25 = int_to_ptr.vmem [resolvable:$true] %s989_s25  ;;  %s992_s0 = int_to_ptr.hbm [resolvable:$true] %s991_s0 }
  0x33   :  { %249 = vmatpush.msra.mxu1 %v244_v5  ;;  %286 = vmatpush.msra.mxu2 %v285_v15  ;;  %v284_v17 = vld [vmem:[#allocation16 + $0x70] sm:$0xff]  ;;  %v325_v18 = vld [vmem:[#allocation17 + $0x78] sm:$0xff]  ;;  %v283_v19 = vld [vmem:[#allocation16 + $0x68] sm:$0xff] }
  0x34   :  { %212 = vmatpush.msra.mxu0 %v205_v6  ;;  %v324_v20 = vld [vmem:[#allocation17 + $0x70] sm:$0xff]  ;;  %v200_v21 = vld [vmem:[#allocation14 + $0x38] sm:$0xff]  ;;  %326 = vmatpush.msra.mxu3 %v325_v18  ;;  %v282_v23 = vld [vmem:[#allocation16 + $0x60] sm:$0xff] }
  0x35   :  { %250 = vmatpush.msra.mxu1 %v243_v7  ;;  %v238_v22 = vld [vmem:[#allocation13 + $0x38] sm:$0xff]  ;;  %287 = vmatpush.msra.mxu2 %v284_v17  ;;  %v323_v24 = vld [vmem:[#allocation17 + $0x68] sm:$0xff]  ;;  %v199_v25 = vld [vmem:[#allocation14 + $0x30] sm:$0xff] }
  0x36   :  { %213 = vmatpush.msra.mxu0 %v204_v8  ;;  %v237_v26 = vld [vmem:[#allocation13 + $0x30] sm:$0xff]  ;;  %327 = vmatpush.msra.mxu3 %v324_v20  ;;  %v281_v27 = vld [vmem:[#allocation16 + $0x58] sm:$0xff]  ;;  %v322_v28 = vld [vmem:[#allocation17 + $0x60] sm:$0xff] }
  0x37   :  { %251 = vmatpush.msra.mxu1 %v242_v9  ;;  %288 = vmatpush.msra.mxu2 %v283_v19  ;;  %v198_v29 = vld [vmem:[#allocation14 + $0x28] sm:$0xff]  ;;  %v280_v31 = vld [vmem:[#allocation16 + $0x50] sm:$0xff]  ;;  %v321_v32 = vld [vmem:[#allocation17 + $0x58] sm:$0xff] }
  0x38   :  { %214 = vmatpush.msra.mxu0 %v203_v10  ;;  %v236_v30 = vld [vmem:[#allocation13 + $0x28] sm:$0xff]  ;;  %328 = vmatpush.msra.mxu3 %v323_v24  ;;  %v197_v33 = vld [vmem:[#allocation14 + $0x20] sm:$0xff]  ;;  %v320_v36 = vld [vmem:[#allocation17 + $0x50] sm:$0xff] }
  0x39   :  { %252 = vmatpush.msra.mxu1 %v241_v11  ;;  %289 = vmatpush.msra.mxu2 %v282_v23  ;;  %v235_v34 = vld [vmem:[#allocation13 + $0x20] sm:$0xff]  ;;  %v279_v35 = vld [vmem:[#allocation16 + $0x48] sm:$0xff]  ;;  %v196_v37 = vld [vmem:[#allocation14 + $0x18] sm:$0xff] }
  0x3a   :  { %215 = vmatpush.msra.mxu0 %v202_v12  ;;  %329 = vmatpush.msra.mxu3 %v322_v28  ;;  %v234_v38 = vld [vmem:[#allocation13 + $0x18] sm:$0xff]  ;;  %v278_v39 = vld [vmem:[#allocation16 + $0x40] sm:$0xff]  ;;  %v319_v40 = vld [vmem:[#allocation17 + $0x48] sm:$0xff] }
  0x3b   :  { %253 = vmatpush.msra.mxu1 %v240_v13  ;;  %290 = vmatpush.msra.mxu2 %v281_v27  ;;  %v195_v41 = vld [vmem:[#allocation14 + $0x10] sm:$0xff]  ;;  %v277_v43 = vld [vmem:[#allocation16 + $0x38] sm:$0xff]  ;;  %v318_v44 = vld [vmem:[#allocation17 + $0x40] sm:$0xff] }
  0x3c   :  { %216 = vmatpush.msra.mxu0 %v201_v14  ;;  %330 = vmatpush.msra.mxu3 %v321_v32  ;;  %v233_v42 = vld [vmem:[#allocation13 + $0x10] sm:$0xff]  ;;  %v194_v45 = vld [vmem:[#allocation14 + $0x8] sm:$0xff]  ;;  %v317_v48 = vld [vmem:[#allocation17 + $0x38] sm:$0xff] }
  0x3d   :  { %254 = vmatpush.msra.mxu1 %v239_v16  ;;  %291 = vmatpush.msra.mxu2 %v280_v31  ;;  %v232_v46 = vld [vmem:[#allocation13 + $0x8] sm:$0xff]  ;;  %v276_v47 = vld [vmem:[#allocation16 + $0x30] sm:$0xff]  ;;  %v193_v49 = vld [vmem:[#allocation14] sm:$0xff] }
  0x3e   :  { %217 = vmatpush.msra.mxu0 %v200_v21  ;;  %331 = vmatpush.msra.mxu3 %v320_v36  ;;  %v231_v50 = vld [vmem:[#allocation13] sm:$0xff]  ;;  %v192_v51 = vld [vmem:[#allocation2] sm:$0xff]  ;;  %v229_v52 = vld [vmem:[#allocation7] sm:$0xff] }
  0x3f   :  { %255 = vmatpush.msra.mxu1 %v238_v22  ;;  %292 = vmatpush.msra.mxu2 %v279_v35  ;;  %v275_v53 = vld [vmem:[#allocation16 + $0x28] sm:$0xff]  ;;  %v316_v54 = vld [vmem:[#allocation17 + $0x30] sm:$0xff]  ;;  %v274_v55 = vld [vmem:[#allocation16 + $0x20] sm:$0xff] }
  0x40   :  { %218 = vmatpush.msra.mxu0 %v199_v25  ;;  %332 = vmatpush.msra.mxu3 %v319_v40  ;;  %v315_v56 = vld [vmem:[#allocation17 + $0x28] sm:$0xff]  ;;  %v273_v57 = vld [vmem:[#allocation16 + $0x18] sm:$0xff]  ;;  %v314_v58 = vld [vmem:[#allocation17 + $0x20] sm:$0xff] }
  0x41   :  { %256 = vmatpush.msra.mxu1 %v237_v26  ;;  %293 = vmatpush.msra.mxu2 %v278_v39  ;;  %v272_v59 = vld [vmem:[#allocation16 + $0x10] sm:$0xff]  ;;  %v313_v60 = vld [vmem:[#allocation17 + $0x18] sm:$0xff]  ;;  %v271_v62 = vld [vmem:[#allocation16 + $0x8] sm:$0xff] }
  0x42   :  { %219 = vmatpush.msra.mxu0 %v198_v29  ;;  %333 = vmatpush.msra.mxu3 %v318_v44  ;;  %v230_v61 = vld [vmem:[#allocation7 + $0x8] sm:$0xff]  ;;  %v270_v0 = vld [vmem:[#allocation16] sm:$0xff]  ;;  %v311_v1 = vld [vmem:[#allocation17 + $0x8] sm:$0xff] }
  0x43   :  { %257 = vmatpush.msra.mxu1 %v236_v30  ;;  %294 = vmatpush.msra.mxu2 %v277_v43  ;;  %v312_v63 = vld [vmem:[#allocation17 + $0x10] sm:$0xff]  ;;  %v310_v2 = vld [vmem:[#allocation17] sm:$0xff]  ;;  %v1096_v6 = vld [vmem:[#allocation10 + $0x18] sm:$0xff] }
  0x44   :  { %220 = vmatpush.msra.mxu0 %v197_v33  ;;  %334 = vmatpush.msra.mxu3 %v317_v48  ;;  %v309_v3 = vld [vmem:[#allocation5] sm:$0xff]  ;;  %v1095_v5 = vld [vmem:[#allocation10 + $0x10] sm:$0xff]  ;;  %v1100_v9 = vld [vmem:[#allocation10 + $0x38] sm:$0xff] }
  0x45   :  { %258 = vmatpush.msra.mxu1 %v235_v34  ;;  %295 = vmatpush.msra.mxu2 %v276_v47  ;;  %v1093_v4 = vld [vmem:[#allocation10] sm:$0xff]  ;;  %v1099_v8 = vld [vmem:[#allocation10 + $0x30] sm:$0xff]  ;;  %v1094_v24 = vld [vmem:[#allocation10 + $0x8] sm:$0xff] }
  0x46   :  { %221 = vmatpush.msra.mxu0 %v196_v37  ;;  %335 = vmatpush.msra.mxu3 %v316_v54  ;;  %v1097_v7 = vld [vmem:[#allocation10 + $0x20] sm:$0xff]  ;;  %v1098_v26 = vld [vmem:[#allocation10 + $0x28] sm:$0xff] }
  0x47   :  { %259 = vmatpush.msra.mxu1 %v234_v38  ;;  %296 = vmatpush.msra.mxu2 %v275_v53 }
  0x48   :  { %222 = vmatpush.msra.mxu0 %v195_v41  ;;  %336 = vmatpush.msra.mxu3 %v315_v56 }
  0x49   :  { %260 = vmatpush.msra.mxu1 %v233_v42  ;;  %297 = vmatpush.msra.mxu2 %v274_v55 }
  0x4a   :  { %223 = vmatpush.msra.mxu0 %v194_v45  ;;  %337 = vmatpush.msra.mxu3 %v314_v58 }
  0x4b   :  { %261 = vmatpush.msra.mxu1 %v232_v46  ;;  %298 = vmatpush.msra.mxu2 %v273_v57 }
  0x4c   :  { %224 = vmatpush.msra.mxu0 %v193_v49  ;;  %338 = vmatpush.msra.mxu3 %v313_v60 }
  0x4d   :  { %262 = vmatpush.msra.mxu1 %v231_v50  ;;  %225 = vmatmul.f32.vlgmr.msra.gmra.mxu0 %v192_v51 }
  0x4e   :  { %263 = vmatmul.f32.vlgmr.msra.gmra.mxu1 %v229_v52  ;;  %299 = vmatpush.msra.mxu2 %v272_v59 }
  0x4f   :  { %339 = vmatpush.msra.mxu3 %v312_v63  ;;  %487 = vmatpush.bf16.xpose.msrb.mxu1 %v1095_v5 }
  0x50   :  { %300 = vmatpush.msra.mxu2 %v271_v62 }
  0x51   :  { %340 = vmatpush.msra.mxu3 %v311_v1 }
  0x52   :  { %301 = vmatpush.msra.mxu2 %v270_v0 }
  0x53   :  { %302 = vmatmul.f32.vlgmr.msra.gmra.mxu2 %v229_v52  ;;  %341 = vmatpush.msra.mxu3 %v310_v2 }
  0x54   :  { %342 = vmatmul.f32.vlgmr.msra.gmra.mxu3 %v309_v3  ;;  %509 = vmatpush.bf16.xpose.msrb.mxu2 %v1096_v6 }
  0x55   :  { %443 = vmatpush.bf16.xpose.msrb.mxu3 %v1093_v4  ;;  %v1582_v4 = vld [vmem:[#allocation8] sm:$0xff] }
  0x56   :  { %266 = vmatmul.f32.gmra.mxu1 %v230_v61  ;;  %vm191_vm8 = vcmp.ne.f32.partialorder %v1582_v4, 0.0 }
  0x57   :  { %575 = vmatpush.bf16.xpose.msra.mxu1 %v1099_v8 }
  0x5b   :  { %305 = vmatmul.f32.gmra.mxu2 %v230_v61 }
  0x5c   :  { %597 = vmatpush.bf16.xpose.msra.mxu2 %v1100_v9 }
  0x5d   :  { %531 = vmatpush.bf16.xpose.msra.mxu3 %v1097_v7 }
  0xca   :  { %v226_v10 = vpop.f32.mrf.mxu0 }
  0xcb   :  { %v1564_v11 = vpop.f32.mrf.mxu1  ;;  %v399_v12 = vpack.c.bf16 %v226_v10, %v226_v10 }
  0xcd   :  { %v401_v13 = vrot.slane %v399_v12, 3 }
  0xcf   :  { %v405_v14 = vsel %vm402_vm0, %v399_v12, %v401_v13  ;;  %v408_v15 = vsel %vm407_vm1, %v399_v12, %v401_v13  ;;  %v412_v27 = vsel %vm411_vm2, %v399_v12, %v401_v13  ;;  %v416_v28 = vsel %vm415_vm3, %v399_v12, %v401_v13 }
  0xd0   :  { %v1011_v16 = vpack.i.b16 %v405_v14, %v405_v14  ;;  %v410_v17 = vrot.slane %v408_v15, 1  ;;  %v420_v29 = vunpack.i.h.s16 %v405_v14  ;;  %v414_v30 = vrot.slane %v412_v27, 2 }
  0xd1   :  { %v418_v31 = vrot.slane %v416_v28, 3  ;;  %v1102_v28 = vld [vmem:[#allocation11 + $0x8] sm:$0xff] }
  0xd2   :  { %v428_v19 = vperm.slane %v1011_v16, 0  ;;  %v1020_v20 = vpack.i.b16 %v410_v17, %v410_v17  ;;  %v422_v21 = vunpack.i.h.s16 %v410_v17  ;;  %v449_v32 = vpack.i.b16 %v420_v29, %v420_v29  ;;  %v1101_v29 = vld [vmem:[#allocation11] sm:$0xff] }
  0xd3   :  { %v1568_v18 = vpop.f32.mrf.mxu1  ;;  %v1029_v33 = vpack.i.b16 %v414_v30, %v414_v30  ;;  %v426_v34 = vunpack.i.h.s16 %v418_v31  ;;  %v1038_v36 = vpack.i.b16 %v418_v31, %v418_v31  ;;  %v424_v41 = vunpack.i.h.s16 %v414_v30  ;;  %v1103_v30 = vld [vmem:[#allocation11 + $0x10] sm:$0xff]  ;;  %v1105_v31 = vld [vmem:[#allocation11 + $0x20] sm:$0xff] }
  0xd4   :  { %360 = vmatpush.xpose.msrb.mxu0 %v1568_v18  ;;  %444 = vmatmul.bf16.vlgmr.msrb.gmra.mxu3 %v428_v19  ;;  %v472_v22 = vperm.slane %v1020_v20, 0  ;;  %v493_v23 = vpack.i.b16 %v422_v21, %v422_v21  ;;  %v450_v35 = vperm.slane %v449_v32, 0  ;;  %v1104_v32 = vld [vmem:[#allocation11 + $0x18] sm:$0xff] }
  0xd5   :  { %v516_v37 = vperm.slane %v1029_v33, 0  ;;  %v581_v38 = vpack.i.b16 %v426_v34, %v426_v34  ;;  %v560_v39 = vperm.slane %v1038_v36, 0  ;;  %v537_v42 = vpack.i.b16 %v424_v41, %v424_v41  ;;  %689 = vmatpush.bf16.msrb.mxu3 %v1101_v29  ;;  %v1106_v33 = vld [vmem:[#allocation11 + $0x28] sm:$0xff]  ;;  %v1107_v34 = vld [vmem:[#allocation11 + $0x30] sm:$0xff] }
  0xd6   :  { %488 = vmatmul.bf16.vlgmr.msrb.gmra.mxu1 %v472_v22  ;;  %v494_v25 = vperm.slane %v493_v23, 0  ;;  %v1574_v44 = vpop.f32.mrf.mxu2 }
  0xd7   :  { %v582_v40 = vperm.slane %v581_v38, 0  ;;  %v538_v43 = vperm.slane %v537_v42, 0  ;;  %v1576_v45 = vpop.f32.mrf.mxu3  ;;  %737 = vmatpush.bf16.msrb.mxu1 %v1103_v30 }
  0xd8   :  { %361 = vmatpush.xpose.msrb.mxu0 %v1564_v11  ;;  %510 = vmatmul.bf16.vlgmr.msrb.gmra.mxu2 %v494_v25 }
  0xd9   :  { %761 = vmatpush.bf16.msrb.mxu2 %v1104_v32 }
  0xdb   :  { %362 = vmatmul.f32.vlgmr.msrb.gmra.mxu0 %v226_v10 }
  0xdc   :  { %465 = vmatpush.bf16.xpose.msra.mxu0 %v1094_v24 }
  0xde   :  { %v1578_v46 = vpop.f32.mrf.mxu2 }
  0xe3   :  { %466 = vmatmul.bf16.vlgmr.msra.gmra.mxu0 %v450_v35 }
  0xe4   :  { %553 = vmatpush.bf16.xpose.msrb.mxu0 %v1098_v26  ;;  %532 = vmatmul.bf16.vlgmr.msra.gmra.mxu3 %v516_v37  ;;  %v1108_v37 = vld [vmem:[#allocation11 + $0x38] sm:$0xff] }
  0xe5   :  { %785 = vmatpush.bf16.msra.mxu3 %v1105_v31 }
  0xe6   :  { %576 = vmatmul.bf16.vlgmr.msra.gmra.mxu1 %v560_v39 }
  0xe7   :  { %833 = vmatpush.bf16.msra.mxu1 %v1107_v34 }
  0xe8   :  { %598 = vmatmul.bf16.vlgmr.msra.gmra.mxu2 %v582_v40 }
  0xe9   :  { %857 = vmatpush.bf16.msra.mxu2 %v1108_v37 }
  0xec   :  { %713 = vmatpush.bf16.msra.mxu0 %v1102_v28 }
  0xf3   :  { %554 = vmatmul.bf16.vlgmr.msrb.gmra.mxu0 %v538_v43 }
  0xf4   :  { %809 = vmatpush.bf16.msrb.mxu0 %v1106_v33 }
 0x153   :  { %v489_v47 = vpop.f32.mrf.mxu1 }
 0x154   :  { %v613_v60 = vrot.slane %v489_v47, 6 }
 0x157   :  { %v445_v49 = vpop.f32.mrf.mxu3 }
 0x158   :  { %v363_v48 = vpop.f32.mrf.mxu0 }
 0x159   :  { %v366_v12 = vmul.f32 %v363_v48, %v1582_v4 }
 0x15b   :  { %v491_v50 = vpop.f32.mrf.mxu1  ;;  %v511_v51 = vpop.f32.mrf.mxu2 }
 0x15c   :  { %v615_v1 = vrot.slane %v511_v51, 5 }
 0x15f   :  { %v447_v52 = vpop.f32.mrf.mxu3 }
 0x160   :  { %v467_v53 = vpop.f32.mrf.mxu0 }
 0x161   :  { %v611_v56 = vrot.slane %v467_v53, 7 }
 0x163   :  { %v513_v54 = vpop.f32.mrf.mxu2  ;;  %v577_v55 = vpop.f32.mrf.mxu1  ;;  %v612_v59 = vsel %vm407_vm1, %v611_v56, %v445_v49 }
 0x164   :  { %v614_v63 = vsel %vm411_vm2, %v613_v60, %v612_v59  ;;  %v623_v7 = vrot.slane %v577_v55, 2 }
 0x165   :  { %v616_v5 = vsel %vm415_vm3, %v615_v1, %v614_v63 }
 0x167   :  { %v533_v58 = vpop.f32.mrf.mxu3 }
 0x168   :  { %v469_v57 = vpop.f32.mrf.mxu0  ;;  %v617_v0 = vrot.slane %v533_v58, 4 }
 0x16a   :  { %v619_v8 = vsel %vm618_vm4, %v617_v0, %v616_v5 }
 0x16b   :  { %v579_v61 = vpop.f32.mrf.mxu1  ;;  %v599_v62 = vpop.f32.mrf.mxu2 }
 0x16c   :  { %v626_v9 = vrot.slane %v599_v62, 1 }
 0x16f   :  { %v535_v2 = vpop.f32.mrf.mxu3 }
 0x170   :  { %v555_v3 = vpop.f32.mrf.mxu0 }
 0x171   :  { %v620_v6 = vrot.slane %v555_v3, 3 }
 0x173   :  { %v622_v10 = vsel %vm621_vm5, %v620_v6, %v619_v8  ;;  %v601_v13 = vpop.f32.mrf.mxu2 }
 0x174   :  { %v625_v14 = vsel %vm624_vm6, %v623_v7, %v622_v10 }
 0x175   :  { %v628_v15 = vsel %vm627_vm7, %v626_v9, %v625_v14 }
 0x176   :  { %v630_v16 = vadd.f32 %v628_v15, %v366_v12 }
 0x178   :  { %v557_v17 = vpop.f32.mrf.mxu0  ;;  %v631_v19 = vmul.f32 0.17677669, %v630_v16 }
 0x17a   :  { %v632_v20 = vsel %vm191_vm8, %v631_v19, -1e+30 }
 0x17b   :  { %v634_v21 = vsel %vm633_vm9, %v632_v20, -inf }
 0x17c   :  { %635 = vmax.xlane.f32.xlu0 %v634_v21 }
 0x1ef   :  { %v636_v22 = vpop.xlane.xlu0 %635 }
 0x1f0   :  { %v637_v23 = vsub.f32 %v632_v20, %v636_v22 }
 0x1f2   :  { %v638_v24 = vmul.f32 1.442695, %v637_v23 }
 0x1f4   :  { %1125 = vpow2.f32 %v638_v24 }
 0x1fa   :  { %v1126_v25 = vpop.eup %1125 }
 0x1fb   :  { %v640_v26 = vsel %vm191_vm8, %v1126_v25, 0.0 }
 0x1fc   :  { %v641_v27 = vsel %vm633_vm9, %v640_v26, 0.0 }
 0x1fd   :  { %642 = vadd.xlane.f32.xlu0 %v641_v27 }
 0x270   :  { %v643_v35 = vpop.xlane.xlu0 %642 }
 0x271   :  { %v644_v36 = vmax.f32 %v643_v35, 1e-30 }
 0x273   :  { %1127 = vrcp.f32 %v644_v36 }
 0x279   :  { %v1128_v38 = vpop.eup %1127 }
 0x27a   :  { %v646_v39 = vmul.f32 %v1128_v38, %v640_v26 }
 0x27c   :  { %v647_v40 = vpack.c.bf16 %v646_v39, %v646_v39 }
 0x27e   :  { %v649_v41 = vrot.slane %v647_v40, 3 }
 0x280   :  { %v652_v42 = vsel %vm402_vm0, %v647_v40, %v649_v41  ;;  %v654_v43 = vsel %vm407_vm1, %v647_v40, %v649_v41  ;;  %v657_v57 = vsel %vm411_vm2, %v647_v40, %v649_v41  ;;  %v660_v59 = vsel %vm415_vm3, %v647_v40, %v649_v41 }
 0x281   :  { %v1047_v47 = vpack.i.b16 %v652_v42, %v652_v42  ;;  %v664_v48 = vunpack.i.h.s16 %v652_v42  ;;  %v656_v49 = vrot.slane %v654_v43, 1  ;;  %v659_v60 = vrot.slane %v657_v57, 2 }
 0x283   :  { %v672_v50 = vperm.slane %v1047_v47, 0  ;;  %v695_v51 = vpack.i.b16 %v664_v48, %v664_v48  ;;  %v1058_v52 = vpack.i.b16 %v656_v49, %v656_v49  ;;  %v666_v53 = vunpack.i.h.s16 %v656_v49 }
 0x284   :  { %v668_v61 = vunpack.i.h.s16 %v659_v60  ;;  %v1069_v62 = vpack.i.b16 %v659_v60, %v659_v60 }
 0x285   :  { %1052 = vmatmul.msk.bf16.vlgmr.msrb.gmra.mxu3 %vm633_vm9, %v672_v50  ;;  %v696_v54 = vperm.slane %v695_v51, 0  ;;  %v720_v55 = vperm.slane %v1058_v52, 0  ;;  %v743_v56 = vpack.i.b16 %v666_v53, %v666_v53 }
 0x286   :  { %903 = vmatpush.msrb.mxu3 %v1578_v46  ;;  %v662_v46 = vrot.slane %v660_v59, 3  ;;  %v791_v0 = vpack.i.b16 %v668_v61, %v668_v61 }
 0x287   :  { %1057 = vmatmul.msk.bf16.vlgmr.msra.gmra.mxu0 %vm633_vm9, %v696_v54  ;;  %1063 = vmatmul.msk.bf16.vlgmr.msrb.gmra.mxu1 %vm633_vm9, %v720_v55  ;;  %v744_v58 = vperm.slane %v743_v56, 0 }
 0x288   :  { %904 = vmatpush.msrb.mxu3 %v1574_v44  ;;  %924 = vmatpush.xpose.msra.mxu0 %v1568_v18  ;;  %v670_v63 = vunpack.i.h.s16 %v662_v46  ;;  %v1080_v1 = vpack.i.b16 %v662_v46, %v662_v46  ;;  %v768_v44 = vperm.slane %v1069_v62, 0  ;;  %v792_v3 = vperm.slane %v791_v0, 0 }
 0x289   :  { %966 = vmatpush.msrb.mxu1 %v1568_v18  ;;  %1068 = vmatmul.msk.bf16.vlgmr.msrb.gmra.mxu2 %vm633_vm9, %v744_v58 }
 0x28a   :  { %v839_v2 = vpack.i.b16 %v670_v63, %v670_v63  ;;  %v816_v5 = vperm.slane %v1080_v1, 0 }
 0x28b   :  { %967 = vmatpush.msrb.mxu1 %v1564_v11 }
 0x28c   :  { %925 = vmatpush.xpose.msra.mxu0 %v1564_v11  ;;  %v840_v18 = vperm.slane %v839_v2, 0 }
 0x295   :  { %1074 = vmatmul.msk.bf16.vlgmr.msra.gmra.mxu3 %vm633_vm9, %v768_v44 }
 0x297   :  { %1079 = vmatmul.msk.bf16.vlgmr.msrb.gmra.mxu0 %vm633_vm9, %v792_v3  ;;  %1085 = vmatmul.msk.bf16.vlgmr.msra.gmra.mxu1 %vm633_vm9, %v816_v5 }
 0x299   :  { %1090 = vmatmul.msk.bf16.vlgmr.msra.gmra.mxu2 %vm633_vm9, %v840_v18 }
 0x2a5   :  { %1091 = vmatmul.msk.f32.vlgmr.msrb.gmra.mxu3 %vm633_vm9, %v646_v39 }
 0x2a7   :  { %926 = vmatmul.f32.vlgmr.msra.gmra.mxu0 %v1576_v45 }
 0x304   :  { %v715_v11 = vpop.f32.mrf.mxu0  ;;  %v739_v6 = vpop.f32.mrf.mxu1 }
 0x305   :  { %v871_v16 = vrot.slane %v715_v11, 7  ;;  %v873_v21 = vrot.slane %v739_v6, 6 }
 0x308   :  { %v691_v7 = vpop.f32.mrf.mxu3 }
 0x309   :  { %v872_v19 = vsel %vm407_vm1, %v871_v16, %v691_v7 }
 0x30a   :  { %v874_v45 = vsel %vm411_vm2, %v873_v21, %v872_v19 }
 0x30c   :  { %v717_v8 = vpop.f32.mrf.mxu0  ;;  %v741_v9 = vpop.f32.mrf.mxu1 }
 0x30d   :  { %v763_v10 = vpop.f32.mrf.mxu2 }
 0x30e   :  { %v875_v20 = vrot.slane %v763_v10, 5 }
 0x310   :  { %v693_v12 = vpop.f32.mrf.mxu3  ;;  %v876_v26 = vsel %vm415_vm3, %v875_v20, %v874_v45 }
 0x314   :  { %v811_v13 = vpop.f32.mrf.mxu0  ;;  %v835_v14 = vpop.f32.mrf.mxu1 }
 0x315   :  { %v765_v15 = vpop.f32.mrf.mxu2  ;;  %v879_v28 = vrot.slane %v811_v13, 3  ;;  %v881_v31 = vrot.slane %v835_v14, 2 }
 0x318   :  { %v787_v17 = vpop.f32.mrf.mxu3 }
 0x319   :  { %v877_v22 = vrot.slane %v787_v17, 4 }
 0x31b   :  { %v878_v27 = vsel %vm618_vm4, %v877_v22, %v876_v26 }
 0x31c   :  { %v813_v23 = vpop.f32.mrf.mxu0  ;;  %v837_v24 = vpop.f32.mrf.mxu1  ;;  %v880_v30 = vsel %vm621_vm5, %v879_v28, %v878_v27 }
 0x31d   :  { %v859_v25 = vpop.f32.mrf.mxu2  ;;  %v882_v36 = vsel %vm624_vm6, %v881_v31, %v880_v30 }
 0x31e   :  { %v883_v32 = vrot.slane %v859_v25, 1 }
 0x320   :  { %v789_v29 = vpop.f32.mrf.mxu3  ;;  %v884_v38 = vsel %vm627_vm7, %v883_v32, %v882_v36 }
 0x324   :  { %v927_v33 = vpop.f32.mrf.mxu0 }
 0x325   :  { %v861_v34 = vpop.f32.mrf.mxu2  ;;  %v930_v35 = vmul.f32 %v927_v33, %v1582_v4 }
 0x327   :  { %v931_v37 = vmul.f32 0.17677669, %v930_v35 }
 0x328   :  { %v906_v39 = vpop.f32.mrf.mxu3 }
 0x329   :  { %v907_v40 = vadd.f32 %v906_v39, %v884_v38  ;;  %v932_v41 = vsel %vm191_vm8, %v931_v37, -1e+30 }
 0x32a   :  { %v933_v42 = vsel %vm633_vm9, %v932_v41, -inf }
 0x32b   :  { %909 = vst [vmem:[#allocation19] sm:$0xff] %v907_v40  ;;  %934 = vmax.xlane.f32.xlu1 %v933_v42 }
 0x32c   :  { %983 = dma.vmem_to_hbm [thread:$0]  %s979_s24, 128, %s981_s20, [#allocation4]  }
 0x39e   :  { %v935_v43 = vpop.xlane.xlu1 %934 }
 0x39f   :  { %v936_v47 = vsub.f32 %v932_v41, %v935_v43 }
 0x3a1   :  { %v937_v48 = vmul.f32 1.442695, %v936_v47 }
 0x3a3   :  { %1129 = vpow2.f32 %v937_v48 }
 0x3a9   :  { %v1130_v49 = vpop.eup %1129 }
 0x3aa   :  { %v939_v50 = vsel %vm191_vm8, %v1130_v49, 0.0 }
 0x3ab   :  { %v940_v51 = vsel %vm633_vm9, %v939_v50, 0.0 }
 0x3ac   :  { %941 = vadd.xlane.f32.xlu1 %v940_v51 }
 0x41f   :  { %v942_v52 = vpop.xlane.xlu1 %941 }
 0x420   :  { %v943_v53 = vmax.f32 %v942_v52, 1e-30 }
 0x422   :  { %1131 = vrcp.f32 %v943_v53 }
 0x428   :  { %v1132_v54 = vpop.eup %1131 }
 0x429   :  { %v945_v55 = vmul.f32 %v1132_v54, %v939_v50 }
 0x42b   :  { %1092 = vmatmul.msk.f32.vlgmr.msrb.gmra.mxu1 %vm633_vm9, %v945_v55  ;;  %v946_v56 = vsel %vm633_vm9, %v945_v55, 0.0 }
 0x42c   :  { %947 = vadd.xlane.f32.xlu2 %v946_v56 }
 0x49f   :  { %v948_v4 = vpop.xlane.xlu2 %947 }
 0x4a8   :  { %v969_v57 = vpop.f32.mrf.mxu1 }
 0x4a9   :  { %v970_v58 = vadd.f32 %v969_v57, %v948_v4 }
 0x4ab   :  { %972 = vst [vmem:[#allocation20] sm:$0xff] %v970_v58 }
 0x4ac   :  { %994 = dma.vmem_to_hbm [thread:$0]  %s990_s25, 128, %s992_s0, [#allocation21]  }
 0x4ad   :  { %1433 = dma.done.wait [#allocation4], 128  }
 0x4ae   :  { %1434 = vsyncadd [#allocation4], 4294967168 }
 0x4af   :  { %1435 = dma.done.wait [#allocation21], 128  }
 0x4b0   :  { %1436 = vsyncadd [#allocation21], 4294967168 }
 0x4b1   :  { %1003 = vsyncpa [#allocation3], 1 }
 0x4b2   :  { %1004 = vsyncpa [#allocation6], 1 }
 0x4b3   :  { %1005 = vsyncpa [#allocation9], 1 }
 0x4b4   :  { %1006 = vsyncpa [#allocation12], 1 }
 0x4b5   :  { %1007 = vsyncpa [#allocation15], 1 }
 0x4b6   :  { %1008 = vsyncpa [#allocation18], 1 }
 0x4b7   :  { %1009 = vsyncpa [#allocation4], 1 }
 0x4b8   :  { %1010 = vsyncpa [#allocation21], 1 }

</bundles_post_ra>
